<compile_context>
chip_gen: v6e
topology: v6e:2x2x1
jax: 0.10.0
libtpu: 0.0.40
codegen_flags: <defaults>
</compile_context>

<pallas_src>
import functools

import jax
import jax.numpy as jnp
from jax.experimental import pallas as pl
from jax.experimental.pallas import tpu as pltpu

n_embed = 32
hidden = 4 * n_embed  # 128
FOLD = 4              # tokens folded per lane-dense row (4 * 32 = 128 lanes)


def _round_up(x: int, m: int) -> int:
    return ((x + m - 1) // m) * m


def _cdiv(a: int, b: int) -> int:
    return (a + b - 1) // b


def _block_diag(w, f: int):
    """Tile w (a, b) into an (f*a, f*b) block-diagonal matrix (tiny, one-time)."""
    a, b = w.shape
    out = jnp.zeros((f * a, f * b), w.dtype)
    for i in range(f):
        out = out.at[i * a:(i + 1) * a, i * b:(i + 1) * b].set(w)
    return out


def ffwd_kernel(x_ref, w1_ref, b1_ref, w2_ref, b2_ref, o_ref):
    # x_ref:  (RB, 4*C)   stream dtype -- 4 tokens per row, 128 lanes
    # w1_ref: (4*C, 4*H)  stream dtype -- block-diag W1^T, VMEM-resident
    # b1_ref: (1, 4*H)    f32
    # w2_ref: (4*H, 4*C)  stream dtype -- block-diag W2^T, VMEM-resident
    # b2_ref: (1, 4*C)    f32
    # o_ref:  (RB, 4*C)   stream dtype
    x = x_ref[...]
    h = jnp.dot(x, w1_ref[...], preferred_element_type=jnp.float32)
    h = jnp.maximum(h + b1_ref[...], 0.0)                  # bias + ReLU in f32 (VPU)
    y = jnp.dot(h.astype(w2_ref.dtype), w2_ref[...],
                preferred_element_type=jnp.float32) + b2_ref[...]
    o_ref[...] = y.astype(o_ref.dtype)


@functools.partial(jax.jit, static_argnames=("tm",))
def feed_forward(x, w1, b1, w2, b2, *, tm: int = 8192):
    """x: (B, T, n_embed) -> (B, T, n_embed), same dtype as x.

    w1: (hidden, n_embed), b1: (hidden,), w2: (n_embed, hidden), b2: (n_embed,)
    (PyTorch (out_features, in_features) layout).  Pass bf16 x for ~2x less
    HBM traffic; f32 x preserves the reference numerics.
    """
    B, T, C = x.shape
    H = w1.shape[0]
    M = B * T
    F = FOLD
    FC, FH = F * C, F * H
    stream_dtype = x.dtype

    # ---- choose a full-block tiling over folded rows (no ragged tail) ----
    rows_needed = _cdiv(M, F)
    max_rows = max(16, (tm // F) // 16 * 16)
    num_blocks = _cdiv(rows_needed, max_rows)
    rb = _round_up(_cdiv(rows_needed, num_blocks), 16)   # 16-row align (bf16-safe)
    rows_total = num_blocks * rb
    M_pad = rows_total * F

    # ---- lane-dense fold: (M, C) -> (rows, F*C); reshape of contiguous data is free ----
    x2 = x.reshape(M, C)
    if M_pad != M:
        # TODO(synk): ragged tokens are handled by a small pad/unpad copy here;
        # for aligned M (the common case) both branches are no-ops.
        x2 = jnp.pad(x2, ((0, M_pad - M), (0, 0)))
    xf = x2.reshape(rows_total, FC)

    # ---- tiny one-time weight prep: transpose + 4x block-diagonal ----
    w1f = _block_diag(w1.T.astype(stream_dtype), F)        # (FC, FH)
    w2f = _block_diag(w2.T.astype(stream_dtype), F)        # (FH, FC)
    b1f = jnp.tile(b1.astype(jnp.float32), F).reshape(1, FH)
    b2f = jnp.tile(b2.astype(jnp.float32), F).reshape(1, FC)

    itemsize = jnp.dtype(stream_dtype).itemsize
    cost = pl.CostEstimate(
        flops=2 * rows_total * 2 * FC * FH,
        transcendentals=0,
        bytes_accessed=(2 * rows_total * FC * itemsize            # x in + y out
                        + 2 * FC * FH * itemsize                  # weights
                        + (FH + FC) * 4),                         # biases
    )

    outf = pl.pallas_call(
        ffwd_kernel,
        out_shape=jax.ShapeDtypeStruct((rows_total, FC), stream_dtype),
        grid=(num_blocks,),
        in_specs=[
            pl.BlockSpec((rb, FC), lambda i: (i, 0)),    # x row-block, pipelined
            pl.BlockSpec((FC, FH), lambda i: (0, 0)),    # W1 block-diag, resident
            pl.BlockSpec((1, FH), lambda i: (0, 0)),     # b1 resident
            pl.BlockSpec((FH, FC), lambda i: (0, 0)),    # W2 block-diag, resident
            pl.BlockSpec((1, FC), lambda i: (0, 0)),     # b2 resident
        ],
        out_specs=pl.BlockSpec((rb, FC), lambda i: (i, 0)),
        compiler_params=pltpu.CompilerParams(
            dimension_semantics=("parallel",),           # megacore shard on v7x
            vmem_limit_bytes=32 * 1024 * 1024,           # > v5e's 16 MiB default
        ),
        cost_estimate=cost,
    )(xf, w1f, b1f, w2f, b2f)

    out = outf.reshape(M_pad, C)
    if M_pad != M:
        out = out[:M]
    return out.reshape(B, T, C)


def init_params(key):
    """nn.Linear-style U(-1/sqrt(fan_in), 1/sqrt(fan_in)) init, PyTorch layout."""
    k1, k2, k3, k4 = jax.random.split(key, 4)
    bound1 = 1.0 / jnp.sqrt(n_embed)
    bound2 = 1.0 / jnp.sqrt(hidden)
    w1 = jax.random.uniform(k1, (hidden, n_embed), jnp.float32, -bound1, bound1)
    b1 = jax.random.uniform(k2, (hidden,), jnp.float32, -bound1, bound1)
    w2 = jax.random.uniform(k3, (n_embed, hidden), jnp.float32, -bound2, bound2)
    b2 = jax.random.uniform(k4, (n_embed,), jnp.float32, -bound2, bound2)
    return w1, b1, w2, b2


if __name__ == "__main__":
    key = jax.random.PRNGKey(0)
    kx, kp = jax.random.split(key)

    B, T = 2, 8
    x = jax.random.normal(kx, (B, T, n_embed), jnp.float32)
    w1, b1, w2, b2 = init_params(kp)

    def ref_ffwd(xx):
        return jnp.maximum(xx @ w1.T + b1, 0.0) @ w2.T + b2

    # f32 path (PyTorch default semantics).
    out = jax.block_until_ready(feed_forward(x, w1, b1, w2, b2))
    ref = ref_ffwd(x)
    assert out.shape == (B, T, n_embed)
    assert jnp.allclose(out, ref, atol=1e-3, rtol=1e-3)

    # bf16 streaming path (halves HBM bytes; f32 accumulation inside).
    out_bf16 = jax.block_until_ready(
        feed_forward(x.astype(jnp.bfloat16), w1, b1, w2, b2))
    assert out_bf16.dtype == jnp.bfloat16
    assert jnp.allclose(out_bf16.astype(jnp.float32), ref, atol=5e-2, rtol=5e-2)

    # Multi-block grid + token count not divisible by fold/tile
    # (exercises the pad/unpad tail and the "parallel" grid axis).
    x_big = jax.random.normal(kx, (2, 500, n_embed), jnp.float32)
    out_big = jax.block_until_ready(feed_forward(x_big, w1, b1, w2, b2, tm=256))
    assert jnp.allclose(out_big, ref_ffwd(x_big), atol=1e-3, rtol=1e-3)

    print("KERNEL_OK")
</pallas_src>

<mosaic_0001>
module attributes {stable_mosaic.version = 11 : i64} {
  func.func @ffwd_kernel(%arg0: i32, %arg1: memref<16x128xf32, #tpu.memory_space<vmem>>, %arg2: memref<128x512xf32, #tpu.memory_space<vmem>>, %arg3: memref<1x512xf32, #tpu.memory_space<vmem>>, %arg4: memref<512x128xf32, #tpu.memory_space<vmem>>, %arg5: memref<1x128xf32, #tpu.memory_space<vmem>>, %arg6: memref<16x128xf32, #tpu.memory_space<vmem>>) attributes {dimension_semantics = [#tpu.dimension_semantics<parallel>], iteration_bounds = array<i64: 1>, scalar_prefetch = 0 : i64, scratch_operands = 0 : i64, tpu.core_type = #tpu.core_type<tc>, window_params = [{transform_indices = @transform_0, window_bounds = array<i64: 16, 128>}, {pipeline_mode = #tpu.pipeline_mode<synchronous>, transform_indices = @transform_1, window_bounds = array<i64: 128, 512>}, {pipeline_mode = #tpu.pipeline_mode<synchronous>, transform_indices = @transform_2, window_bounds = array<i64: 1, 512>}, {pipeline_mode = #tpu.pipeline_mode<synchronous>, transform_indices = @transform_3, window_bounds = array<i64: 512, 128>}, {pipeline_mode = #tpu.pipeline_mode<synchronous>, transform_indices = @transform_4, window_bounds = array<i64: 1, 128>}, {transform_indices = @transform_5, window_bounds = array<i64: 16, 128>}]} {
    %c0 = arith.constant 0 : index
    %c0_0 = arith.constant 0 : index
    %0 = vector.load %arg1[%c0, %c0_0] : memref<16x128xf32, #tpu.memory_space<vmem>>, vector<16x128xf32>
    %c0_1 = arith.constant 0 : index
    %c0_2 = arith.constant 0 : index
    %1 = vector.load %arg2[%c0_1, %c0_2] : memref<128x512xf32, #tpu.memory_space<vmem>>, vector<128x512xf32>
    %cst = arith.constant dense<0.000000e+00> : vector<16x512xf32>
    %2 = tpu.matmul %0, %1, %cst {dimension_numbers = #tpu.dot_dimension_numbers<[1], [0], [0], [1], [0, 0, 1, 1], [], []>} : vector<16x128xf32>, vector<128x512xf32>, vector<16x512xf32> -> vector<16x512xf32>
    %c0_3 = arith.constant 0 : index
    %c0_4 = arith.constant 0 : index
    %3 = vector.load %arg3[%c0_3, %c0_4] : memref<1x512xf32, #tpu.memory_space<vmem>>, vector<1x512xf32>
    %4 = vector.broadcast %3 : vector<1x512xf32> to vector<16x512xf32>
    %5 = arith.addf %2, %4 : vector<16x512xf32>
    %cst_5 = arith.constant 0.000000e+00 : f32
    %6 = vector.broadcast %cst_5 : f32 to vector<16x512xf32>
    %7 = arith.maximumf %5, %6 : vector<16x512xf32>
    %c0_6 = arith.constant 0 : index
    %c0_7 = arith.constant 0 : index
    %8 = vector.load %arg4[%c0_6, %c0_7] : memref<512x128xf32, #tpu.memory_space<vmem>>, vector<512x128xf32>
    %cst_8 = arith.constant dense<0.000000e+00> : vector<16x128xf32>
    %9 = tpu.matmul %7, %8, %cst_8 {dimension_numbers = #tpu.dot_dimension_numbers<[1], [0], [0], [1], [0, 0, 1, 1], [], []>} : vector<16x512xf32>, vector<512x128xf32>, vector<16x128xf32> -> vector<16x128xf32>
    %c0_9 = arith.constant 0 : index
    %c0_10 = arith.constant 0 : index
    %10 = vector.load %arg5[%c0_9, %c0_10] : memref<1x128xf32, #tpu.memory_space<vmem>>, vector<1x128xf32>
    %11 = vector.broadcast %10 : vector<1x128xf32> to vector<16x128xf32>
    %12 = arith.addf %9, %11 : vector<16x128xf32>
    %c0_11 = arith.constant 0 : index
    %c0_12 = arith.constant 0 : index
    %13 = vector.load %arg6[%c0_11, %c0_12] : memref<16x128xf32, #tpu.memory_space<vmem>>, vector<16x128xf32>
    tpu.vector_store %arg6[%c0_11, %c0_12], %12 {strides = array<i32>} : memref<16x128xf32, #tpu.memory_space<vmem>>, vector<16x128xf32>,
    return
  }
  func.func @transform_0(%arg0: i32) -> (i32, i32) {
    %c0_i32 = arith.constant 0 : i32
    %c0_i32_0 = arith.constant 0 : i32
    return %arg0, %c0_i32 : i32, i32
  }
  func.func @transform_1(%arg0: i32) -> (i32, i32) {
    %c0_i32 = arith.constant 0 : i32
    %c0_i32_0 = arith.constant 0 : i32
    %c0_i32_1 = arith.constant 0 : i32
    return %c0_i32, %c0_i32_0 : i32, i32
  }
  func.func @transform_2(%arg0: i32) -> (i32, i32) {
    %c0_i32 = arith.constant 0 : i32
    %c0_i32_0 = arith.constant 0 : i32
    %c0_i32_1 = arith.constant 0 : i32
    return %c0_i32, %c0_i32_0 : i32, i32
  }
  func.func @transform_3(%arg0: i32) -> (i32, i32) {
    %c0_i32 = arith.constant 0 : i32
    %c0_i32_0 = arith.constant 0 : i32
    %c0_i32_1 = arith.constant 0 : i32
    return %c0_i32, %c0_i32_0 : i32, i32
  }
  func.func @transform_4(%arg0: i32) -> (i32, i32) {
    %c0_i32 = arith.constant 0 : i32
    %c0_i32_0 = arith.constant 0 : i32
    %c0_i32_1 = arith.constant 0 : i32
    return %c0_i32, %c0_i32_0 : i32, i32
  }
  func.func @transform_5(%arg0: i32) -> (i32, i32) {
    %c0_i32 = arith.constant 0 : i32
    %c0_i32_0 = arith.constant 0 : i32
    return %arg0, %c0_i32 : i32, i32
  }
}

</mosaic_0001>

<bundles_post_ra>
// kernel: tile.18
= control target key start
LH: loop header
LB: loop body
LE: loop exit
PB: predicated region body
PF: predicated region fallthrough
CT: control target
= control target key end

     0   :  { %s22_s0 = inlined_call_operand.vmem [shape: f32[32], index: 0, kind: input, shape index: {}]   ;;  %s23_s1 = inlined_call_operand.vmem [shape: f32[4,32], index: 1, kind: output, shape index: {}]  }
   0x1   :  { %v4_v0 = vld [vmem:[%s22_s0] ss:$0 sm:$0xff] }
   0x2   :  { %5 = vst [vmem:[%s23_s1] sm:$0xf] %v4_v0 }

// kernel: tile.19
= control target key start
LH: loop header
LB: loop body
LE: loop exit
PB: predicated region body
PF: predicated region fallthrough
CT: control target
= control target key end

     0   :  { %vm8_vm0 = vcmask 261120   ;;  %s40_s8 = smov 32   ;;  %s41_s9 = smov 64   ;;  %vm14_vm1 = vcmask 1048320   ;;  %vm20_vm2 = vcmask 785920   ;;  %vm26_vm3 = vcmask 523520   ;;  %s58_s0 = inlined_call_operand.vmem [shape: f32[4,32], index: 0, kind: input, shape index: {}]   ;;  %s59_s1 = inlined_call_operand.vmem [shape: f32[1,128], index: 1, kind: output, shape index: {}]  }
   0x1   :  { %v5_v0 = vld [vmem:[%s58_s0] sm:$0xf]  ;;  %s39_s0 = smov 96  }
   0x2   :  { %6 = vst [vmem:[#allocation1] sm:$0xf] %v5_v0 }
   0x9   :  { %v11_v1 = vld [vmem:[#allocation1 + $0x3] sm:$0x1]   ;;  %v23_v2 = vld [vmem:[#allocation1 + $0x1] sm:$0x1]   ;;  %v7_v3 = vld [vmem:[#allocation1] sm:$0x1]  }
   0xa   :  { %12 = vrot.lane.b32.xlu0 %v11_v1, %s39_s0  ;;  %24 = vrot.lane.b32.xlu1 %v23_v2, %s40_s8  ;;  %v17_v4 = vld [vmem:[#allocation1 + $0x2] sm:$0x1]   ;;  %9 = vst.msk [vmem:[#allocation0] sm:$0x1] %vm8_vm0, %v7_v3  }
   0xe   :  { %18 = vrot.lane.b32.xlu0 %v17_v4, %s41_s9 }
  0x7c   :  { %v13_v5 = vpop.permute.xlu0 %12   ;;  %v25_v6 = vpop.permute.xlu1 %24  }
  0x7d   :  { %15 = vst.msk [vmem:[#allocation0] sm:$0x1] %vm14_vm1, %v13_v5  }
  0x80   :  { %v19_v7 = vpop.permute.xlu0 %18  }
  0x81   :  { %21 = vst.msk [vmem:[#allocation0] sm:$0x1] %vm20_vm2, %v19_v7  }
  0x82   :  { %27 = vst.msk [vmem:[#allocation0] sm:$0x1] %vm26_vm3, %v25_v6  }
  0x89   :  { %v32_v8 = vld [vmem:[#allocation0] sm:$0x1] }
  0x8a   :  { %35 = vst [vmem:[%s59_s1] sm:$0x1] %v32_v8 }

// kernel: tile.13
= control target key start
LH: loop header
LB: loop body
LE: loop exit
PB: predicated region body
PF: predicated region fallthrough
CT: control target
= control target key end

     0   :  { %s22_s0 = inlined_call_operand.vmem [shape: f32[128], index: 0, kind: input, shape index: {}]   ;;  %s23_s1 = inlined_call_operand.vmem [shape: f32[4,128], index: 1, kind: output, shape index: {}]  }
   0x1   :  { %v4_v0 = vld [vmem:[%s22_s0] ss:$0 sm:$0xff] }
   0x2   :  { %5 = vst [vmem:[%s23_s1] sm:$0xf] %v4_v0 }

// kernel: feed_forward.1
= control target key start
LH: loop header
LB: loop body
LE: loop exit
PB: predicated region body
PF: predicated region fallthrough
CT: control target
= control target key end

     0   :  { %v575_v3 = vmov 0.0   ;;  %s1012_s1 = inlined_call_operand.vmem [shape: f32[128,512], index: 1, kind: input, shape index: {}]   ;;  %s1013_s0 = inlined_call_operand.vmem [shape: f32[16,128], index: 0, kind: input, shape index: {}]   ;;  %s1014_s3 = inlined_call_operand.vmem [shape: f32[512,128], index: 3, kind: input, shape index: {}]   ;;  %s1015_s2 = inlined_call_operand.vmem [shape: f32[1,512], index: 2, kind: input, shape index: {}]   ;;  %s1016_s4 = inlined_call_operand.vmem [shape: f32[1,128], index: 4, kind: input, shape index: {}]   ;;  %s1017_s5 = inlined_call_operand.vmem [shape: f32[16,128], index: 5, kind: output, shape index: {}]  }
   0x1   :  { %v83_v0 = vld [vmem:[%s1012_s1 + $0x1e8] sm:$0xff]  ;;  %v85_v1 = vld [vmem:[%s1012_s1 + $0x1f8] sm:$0xff]  ;;  %v82_v2 = vld [vmem:[%s1012_s1 + $0x1e0] sm:$0xff]  ;;  %172 = vmatprep.mubr.f32.mxu0 %v575_v3  ;;  %249 = vmatprep.mubr.f32.mxu1 %v575_v3 }
   0x2   :  { %108 = vmatprep.subr.mxu0 %v83_v0  ;;  %185 = vmatprep.subr.mxu1 %v85_v1  ;;  %v84_v4 = vld [vmem:[%s1012_s1 + $0x1f0] sm:$0xff]  ;;  %v79_v5 = vld [vmem:[%s1012_s1 + $0x1c8] sm:$0xff]  ;;  %v81_v6 = vld [vmem:[%s1012_s1 + $0x1d8] sm:$0xff] }
   0x3   :  { %109 = vmatpush1.msra.mxu0 %v82_v2  ;;  %186 = vmatpush1.msra.mxu1 %v84_v4  ;;  %v78_v7 = vld [vmem:[%s1012_s1 + $0x1c0] sm:$0xff]  ;;  %v80_v8 = vld [vmem:[%s1012_s1 + $0x1d0] sm:$0xff]  ;;  %v75_v9 = vld [vmem:[%s1012_s1 + $0x1a8] sm:$0xff] }
   0x4   :  { %110 = vmatprep.subr.mxu0 %v79_v5  ;;  %187 = vmatprep.subr.mxu1 %v81_v6  ;;  %v77_v10 = vld [vmem:[%s1012_s1 + $0x1b8] sm:$0xff]  ;;  %v74_v11 = vld [vmem:[%s1012_s1 + $0x1a0] sm:$0xff]  ;;  %v76_v12 = vld [vmem:[%s1012_s1 + $0x1b0] sm:$0xff] }
   0x5   :  { %111 = vmatpush1.msra.mxu0 %v78_v7  ;;  %188 = vmatpush1.msra.mxu1 %v80_v8  ;;  %v71_v13 = vld [vmem:[%s1012_s1 + $0x188] sm:$0xff]  ;;  %v73_v14 = vld [vmem:[%s1012_s1 + $0x198] sm:$0xff]  ;;  %v70_v15 = vld [vmem:[%s1012_s1 + $0x180] sm:$0xff] }
   0x6   :  { %112 = vmatprep.subr.mxu0 %v75_v9  ;;  %189 = vmatprep.subr.mxu1 %v77_v10  ;;  %v72_v16 = vld [vmem:[%s1012_s1 + $0x190] sm:$0xff]  ;;  %v67_v17 = vld [vmem:[%s1012_s1 + $0x168] sm:$0xff]  ;;  %v69_v18 = vld [vmem:[%s1012_s1 + $0x178] sm:$0xff] }
   0x7   :  { %113 = vmatpush1.msra.mxu0 %v74_v11  ;;  %190 = vmatpush1.msra.mxu1 %v76_v12  ;;  %v66_v19 = vld [vmem:[%s1012_s1 + $0x160] sm:$0xff]  ;;  %v68_v20 = vld [vmem:[%s1012_s1 + $0x170] sm:$0xff]  ;;  %v63_v21 = vld [vmem:[%s1012_s1 + $0x148] sm:$0xff] }
   0x8   :  { %114 = vmatprep.subr.mxu0 %v71_v13  ;;  %191 = vmatprep.subr.mxu1 %v73_v14  ;;  %v65_v22 = vld [vmem:[%s1012_s1 + $0x158] sm:$0xff]  ;;  %v62_v23 = vld [vmem:[%s1012_s1 + $0x140] sm:$0xff]  ;;  %v64_v24 = vld [vmem:[%s1012_s1 + $0x150] sm:$0xff] }
   0x9   :  { %115 = vmatpush1.msra.mxu0 %v70_v15  ;;  %192 = vmatpush1.msra.mxu1 %v72_v16  ;;  %v59_v25 = vld [vmem:[%s1012_s1 + $0x128] sm:$0xff]  ;;  %v61_v26 = vld [vmem:[%s1012_s1 + $0x138] sm:$0xff]  ;;  %v58_v27 = vld [vmem:[%s1012_s1 + $0x120] sm:$0xff] }
   0xa   :  { %116 = vmatprep.subr.mxu0 %v67_v17  ;;  %193 = vmatprep.subr.mxu1 %v69_v18  ;;  %v60_v28 = vld [vmem:[%s1012_s1 + $0x130] sm:$0xff]  ;;  %v55_v29 = vld [vmem:[%s1012_s1 + $0x108] sm:$0xff]  ;;  %v57_v30 = vld [vmem:[%s1012_s1 + $0x118] sm:$0xff] }
   0xb   :  { %117 = vmatpush1.msra.mxu0 %v66_v19  ;;  %194 = vmatpush1.msra.mxu1 %v68_v20  ;;  %v54_v31 = vld [vmem:[%s1012_s1 + $0x100] sm:$0xff]  ;;  %v56_v32 = vld [vmem:[%s1012_s1 + $0x110] sm:$0xff]  ;;  %v51_v33 = vld [vmem:[%s1012_s1 + $0xe8] sm:$0xff] }
   0xc   :  { %118 = vmatprep.subr.mxu0 %v63_v21  ;;  %195 = vmatprep.subr.mxu1 %v65_v22  ;;  %v53_v34 = vld [vmem:[%s1012_s1 + $0xf8] sm:$0xff]  ;;  %v50_v35 = vld [vmem:[%s1012_s1 + $0xe0] sm:$0xff]  ;;  %v52_v36 = vld [vmem:[%s1012_s1 + $0xf0] sm:$0xff] }
   0xd   :  { %119 = vmatpush1.msra.mxu0 %v62_v23  ;;  %196 = vmatpush1.msra.mxu1 %v64_v24  ;;  %v47_v37 = vld [vmem:[%s1012_s1 + $0xc8] sm:$0xff]  ;;  %v49_v38 = vld [vmem:[%s1012_s1 + $0xd8] sm:$0xff]  ;;  %v46_v39 = vld [vmem:[%s1012_s1 + $0xc0] sm:$0xff] }
   0xe   :  { %120 = vmatprep.subr.mxu0 %v59_v25  ;;  %197 = vmatprep.subr.mxu1 %v61_v26  ;;  %v48_v40 = vld [vmem:[%s1012_s1 + $0xd0] sm:$0xff]  ;;  %v43_v41 = vld [vmem:[%s1012_s1 + $0xa8] sm:$0xff]  ;;  %v45_v42 = vld [vmem:[%s1012_s1 + $0xb8] sm:$0xff] }
   0xf   :  { %121 = vmatpush1.msra.mxu0 %v58_v27  ;;  %198 = vmatpush1.msra.mxu1 %v60_v28  ;;  %v42_v43 = vld [vmem:[%s1012_s1 + $0xa0] sm:$0xff]  ;;  %v44_v44 = vld [vmem:[%s1012_s1 + $0xb0] sm:$0xff]  ;;  %v39_v45 = vld [vmem:[%s1012_s1 + $0x88] sm:$0xff] }
  0x10   :  { %122 = vmatprep.subr.mxu0 %v55_v29  ;;  %199 = vmatprep.subr.mxu1 %v57_v30  ;;  %v41_v46 = vld [vmem:[%s1012_s1 + $0x98] sm:$0xff]  ;;  %v38_v47 = vld [vmem:[%s1012_s1 + $0x80] sm:$0xff]  ;;  %v40_v48 = vld [vmem:[%s1012_s1 + $0x90] sm:$0xff] }
  0x11   :  { %123 = vmatpush1.msra.mxu0 %v54_v31  ;;  %200 = vmatpush1.msra.mxu1 %v56_v32  ;;  %v35_v49 = vld [vmem:[%s1012_s1 + $0x68] sm:$0xff]  ;;  %v37_v50 = vld [vmem:[%s1012_s1 + $0x78] sm:$0xff]  ;;  %v34_v51 = vld [vmem:[%s1012_s1 + $0x60] sm:$0xff] }
  0x12   :  { %124 = vmatprep.subr.mxu0 %v51_v33  ;;  %201 = vmatprep.subr.mxu1 %v53_v34  ;;  %v36_v52 = vld [vmem:[%s1012_s1 + $0x70] sm:$0xff]  ;;  %v31_v53 = vld [vmem:[%s1012_s1 + $0x48] sm:$0xff]  ;;  %v33_v54 = vld [vmem:[%s1012_s1 + $0x58] sm:$0xff] }
  0x13   :  { %125 = vmatpush1.msra.mxu0 %v50_v35  ;;  %202 = vmatpush1.msra.mxu1 %v52_v36  ;;  %v30_v55 = vld [vmem:[%s1012_s1 + $0x40] sm:$0xff]  ;;  %v32_v56 = vld [vmem:[%s1012_s1 + $0x50] sm:$0xff]  ;;  %v27_v57 = vld [vmem:[%s1012_s1 + $0x28] sm:$0xff] }
  0x14   :  { %126 = vmatprep.subr.mxu0 %v47_v37  ;;  %203 = vmatprep.subr.mxu1 %v49_v38  ;;  %v29_v58 = vld [vmem:[%s1012_s1 + $0x38] sm:$0xff]  ;;  %v26_v59 = vld [vmem:[%s1012_s1 + $0x20] sm:$0xff]  ;;  %v28_v60 = vld [vmem:[%s1012_s1 + $0x30] sm:$0xff] }
  0x15   :  { %127 = vmatpush1.msra.mxu0 %v46_v39  ;;  %204 = vmatpush1.msra.mxu1 %v48_v40  ;;  %v23_v61 = vld [vmem:[%s1012_s1 + $0x8] sm:$0xff]  ;;  %v25_v62 = vld [vmem:[%s1012_s1 + $0x18] sm:$0xff]  ;;  %v22_v63 = vld [vmem:[%s1012_s1] sm:$0xff] }
  0x16   :  { %128 = vmatprep.subr.mxu0 %v43_v41  ;;  %205 = vmatprep.subr.mxu1 %v45_v42  ;;  %v24_v0 = vld [vmem:[%s1012_s1 + $0x10] sm:$0xff]  ;;  %v20_v1 = vld [vmem:[%s1013_s0] sm:$0xff]  ;;  %v301_v2 = vld [vmem:[%s1014_s3 + $0xf8] sm:$0xff] }
  0x17   :  { %129 = vmatpush1.msra.mxu0 %v42_v43  ;;  %206 = vmatpush1.msra.mxu1 %v44_v44  ;;  %v333_v4 = vld [vmem:[%s1014_s3 + $0x1f8] sm:$0xff]  ;;  %v21_v7 = vld [vmem:[%s1013_s0 + $0x8] sm:$0xff]  ;;  %v300_v8 = vld [vmem:[%s1014_s3 + $0xf0] sm:$0xff] }
  0x18   :  { %130 = vmatprep.subr.mxu0 %v39_v45  ;;  %207 = vmatprep.subr.mxu1 %v41_v46  ;;  %v285_v5 = vld [vmem:[%s1014_s3 + $0x78] sm:$0xff]  ;;  %v332_v9 = vld [vmem:[%s1014_s3 + $0x1f0] sm:$0xff]  ;;  %v299_v11 = vld [vmem:[%s1014_s3 + $0xe8] sm:$0xff] }
  0x19   :  { %131 = vmatpush1.msra.mxu0 %v38_v47  ;;  %208 = vmatpush1.msra.mxu1 %v40_v48  ;;  %v317_v6 = vld [vmem:[%s1014_s3 + $0x178] sm:$0xff]  ;;  %v316_v10 = vld [vmem:[%s1014_s3 + $0x170] sm:$0xff]  ;;  %v331_v12 = vld [vmem:[%s1014_s3 + $0x1e8] sm:$0xff] }
  0x1a   :  { %132 = vmatprep.subr.mxu0 %v35_v49  ;;  %209 = vmatprep.subr.mxu1 %v37_v50  ;;  %v283_v13 = vld [vmem:[%s1014_s3 + $0x68] sm:$0xff]  ;;  %v298_v15 = vld [vmem:[%s1014_s3 + $0xe0] sm:$0xff]  ;;  %v297_v19 = vld [vmem:[%s1014_s3 + $0xd8] sm:$0xff] }
  0x1b   :  { %133 = vmatpush1.msra.mxu0 %v34_v51  ;;  %210 = vmatpush1.msra.mxu1 %v36_v52  ;;  %v315_v14 = vld [vmem:[%s1014_s3 + $0x168] sm:$0xff]  ;;  %v330_v16 = vld [vmem:[%s1014_s3 + $0x1e0] sm:$0xff]  ;;  %v329_v20 = vld [vmem:[%s1014_s3 + $0x1d8] sm:$0xff] }
  0x1c   :  { %134 = vmatprep.subr.mxu0 %v31_v53  ;;  %211 = vmatprep.subr.mxu1 %v33_v54  ;;  %v282_v17 = vld [vmem:[%s1014_s3 + $0x60] sm:$0xff]  ;;  %v281_v21 = vld [vmem:[%s1014_s3 + $0x58] sm:$0xff]  ;;  %v296_v23 = vld [vmem:[%s1014_s3 + $0xd0] sm:$0xff] }
  0x1d   :  { %135 = vmatpush1.msra.mxu0 %v30_v55  ;;  %212 = vmatpush1.msra.mxu1 %v32_v56  ;;  %v314_v18 = vld [vmem:[%s1014_s3 + $0x160] sm:$0xff]  ;;  %v313_v22 = vld [vmem:[%s1014_s3 + $0x158] sm:$0xff]  ;;  %v328_v24 = vld [vmem:[%s1014_s3 + $0x1d0] sm:$0xff] }
  0x1e   :  { %136 = vmatprep.subr.mxu0 %v27_v57  ;;  %213 = vmatprep.subr.mxu1 %v29_v58  ;;  %v280_v25 = vld [vmem:[%s1014_s3 + $0x50] sm:$0xff]  ;;  %v295_v27 = vld [vmem:[%s1014_s3 + $0xc8] sm:$0xff]  ;;  %v294_v31 = vld [vmem:[%s1014_s3 + $0xc0] sm:$0xff] }
  0x1f   :  { %137 = vmatpush1.msra.mxu0 %v26_v59  ;;  %214 = vmatpush1.msra.mxu1 %v28_v60  ;;  %v312_v26 = vld [vmem:[%s1014_s3 + $0x150] sm:$0xff]  ;;  %v327_v28 = vld [vmem:[%s1014_s3 + $0x1c8] sm:$0xff]  ;;  %v326_v32 = vld [vmem:[%s1014_s3 + $0x1c0] sm:$0xff] }
  0x20   :  { %138 = vmatprep.subr.mxu0 %v23_v61  ;;  %215 = vmatprep.subr.mxu1 %v25_v62  ;;  %v279_v29 = vld [vmem:[%s1014_s3 + $0x48] sm:$0xff]  ;;  %v278_v33 = vld [vmem:[%s1014_s3 + $0x40] sm:$0xff]  ;;  %v293_v35 = vld [vmem:[%s1014_s3 + $0xb8] sm:$0xff] }
  0x21   :  { %139 = vmatpush1.msra.mxu0 %v22_v63  ;;  %216 = vmatpush1.msra.mxu1 %v24_v0  ;;  %v311_v30 = vld [vmem:[%s1014_s3 + $0x148] sm:$0xff]  ;;  %v310_v34 = vld [vmem:[%s1014_s3 + $0x140] sm:$0xff]  ;;  %v325_v36 = vld [vmem:[%s1014_s3 + $0x1b8] sm:$0xff] }
  0x22   :  { %173 = vmatmul.mubr.f32.vlgmr.msra.gmra.mxu0 %v20_v1  ;;  %250 = vmatmul.mubr.f32.vlgmr.msra.gmra.mxu1 %v20_v1  ;;  %v277_v37 = vld [vmem:[%s1014_s3 + $0x38] sm:$0xff]  ;;  %v292_v39 = vld [vmem:[%s1014_s3 + $0xb0] sm:$0xff]  ;;  %v291_v43 = vld [vmem:[%s1014_s3 + $0xa8] sm:$0xff] }
  0x23   :  { %178 = vmatprep.mubr.f32.mxu0 %v575_v3  ;;  %255 = vmatprep.mubr.f32.mxu1 %v575_v3  ;;  %v284_v3 = vld [vmem:[%s1014_s3 + $0x70] sm:$0xff]  ;;  %v309_v38 = vld [vmem:[%s1014_s3 + $0x138] sm:$0xff]  ;;  %v323_v44 = vld [vmem:[%s1014_s3 + $0x1a8] sm:$0xff] }
  0x24   :  { %498 = vmatprep.subr.mxu0 %v301_v2  ;;  %536 = vmatprep.subr.mxu1 %v333_v4  ;;  %v324_v40 = vld [vmem:[%s1014_s3 + $0x1b0] sm:$0xff]  ;;  %v275_v45 = vld [vmem:[%s1014_s3 + $0x28] sm:$0xff]  ;;  %v290_v47 = vld [vmem:[%s1014_s3 + $0xa0] sm:$0xff]  ;;  %v88_v4 = vlaneseq }
  0x25   :  { %499 = vmatpush3.msra.mxu0 %v285_v5  ;;  %537 = vmatpush3.msra.mxu1 %v317_v6  ;;  %v276_v41 = vld [vmem:[%s1014_s3 + $0x30] sm:$0xff]  ;;  %v307_v46 = vld [vmem:[%s1014_s3 + $0x128] sm:$0xff]  ;;  %v322_v48 = vld [vmem:[%s1014_s3 + $0x1a0] sm:$0xff] }
  0x26   :  { %179 = vmatmul.mubr.f32.gmra.mxu0 %v21_v7  ;;  %256 = vmatmul.mubr.f32.gmra.mxu1 %v21_v7  ;;  %v308_v42 = vld [vmem:[%s1014_s3 + $0x130] sm:$0xff]  ;;  %v274_v49 = vld [vmem:[%s1014_s3 + $0x20] sm:$0xff]  ;;  %v289_v51 = vld [vmem:[%s1014_s3 + $0x98] sm:$0xff]  ;;  %v89_v5 = vshrl.u32 %v88_v4, 7 }
  0x27   :  { %500 = vmatprep.subr.mxu0 %v300_v8  ;;  %538 = vmatprep.subr.mxu1 %v332_v9  ;;  %v306_v50 = vld [vmem:[%s1014_s3 + $0x120] sm:$0xff]  ;;  %v321_v52 = vld [vmem:[%s1014_s3 + $0x198] sm:$0xff]  ;;  %v288_v55 = vld [vmem:[%s1014_s3 + $0x90] sm:$0xff] }
  0x28   :  { %501 = vmatpush3.msra.mxu0 %v284_v3  ;;  %539 = vmatpush3.msra.mxu1 %v316_v10  ;;  %v273_v53 = vld [vmem:[%s1014_s3 + $0x18] sm:$0xff]  ;;  %v320_v56 = vld [vmem:[%s1014_s3 + $0x190] sm:$0xff]  ;;  %v287_v59 = vld [vmem:[%s1014_s3 + $0x88] sm:$0xff]  ;;  %v98_v6 = vsub.s32 2, %v89_v5  ;;  %v90_v7 = vsub.s32 0, %v89_v5  ;;  %v94_v9 = vsub.s32 1, %v89_v5 }
  0x29   :  { %502 = vmatprep.subr.mxu0 %v299_v11  ;;  %540 = vmatprep.subr.mxu1 %v331_v12  ;;  %v305_v54 = vld [vmem:[%s1014_s3 + $0x118] sm:$0xff]  ;;  %v272_v57 = vld [vmem:[%s1014_s3 + $0x10] sm:$0xff]  ;;  %v319_v60 = vld [vmem:[%s1014_s3 + $0x188] sm:$0xff]  ;;  %v102_v3 = vsub.s32 3, %v89_v5 }
  0x2a   :  { %503 = vmatpush3.msra.mxu0 %v283_v13  ;;  %541 = vmatpush3.msra.mxu1 %v315_v14  ;;  %v304_v58 = vld [vmem:[%s1014_s3 + $0x110] sm:$0xff]  ;;  %v271_v61 = vld [vmem:[%s1014_s3 + $0x8] sm:$0xff]  ;;  %v286_v63 = vld [vmem:[%s1014_s3 + $0x80] sm:$0xff] }
  0x2b   :  { %504 = vmatprep.subr.mxu0 %v298_v15  ;;  %542 = vmatprep.subr.mxu1 %v330_v16  ;;  %v303_v62 = vld [vmem:[%s1014_s3 + $0x108] sm:$0xff]  ;;  %v318_v0 = vld [vmem:[%s1014_s3 + $0x180] sm:$0xff] }
  0x2c   :  { %505 = vmatpush3.msra.mxu0 %v282_v17  ;;  %543 = vmatpush3.msra.mxu1 %v314_v18  ;;  %v270_v1 = vld [vmem:[%s1014_s3] sm:$0xff] }
  0x2d   :  { %506 = vmatprep.subr.mxu0 %v297_v19  ;;  %544 = vmatprep.subr.mxu1 %v329_v20  ;;  %v302_v2 = vld [vmem:[%s1014_s3 + $0x100] sm:$0xff] }
  0x2e   :  { %507 = vmatpush3.msra.mxu0 %v281_v21  ;;  %545 = vmatpush3.msra.mxu1 %v313_v22  ;;  %v86_v8 = vld [vmem:[%s1015_s2] sm:$0xf] }
  0x2f   :  { %508 = vmatprep.subr.mxu0 %v296_v23  ;;  %546 = vmatprep.subr.mxu1 %v328_v24  ;;  %v99_v10 = vrot.slane %v86_v8, %v98_v6  ;;  %v91_v11 = vrot.slane %v86_v8, %v90_v7  ;;  %v95_v12 = vrot.slane %v86_v8, %v94_v9 }
  0x30   :  { %509 = vmatpush3.msra.mxu0 %v280_v25  ;;  %547 = vmatpush3.msra.mxu1 %v312_v26  ;;  %v103_v13 = vrot.slane %v86_v8, %v102_v3 }
  0x31   :  { %510 = vmatprep.subr.mxu0 %v295_v27  ;;  %548 = vmatprep.subr.mxu1 %v327_v28 }
  0x32   :  { %511 = vmatpush3.msra.mxu0 %v279_v29  ;;  %549 = vmatpush3.msra.mxu1 %v311_v30 }
  0x33   :  { %512 = vmatprep.subr.mxu0 %v294_v31  ;;  %550 = vmatprep.subr.mxu1 %v326_v32 }
  0x34   :  { %513 = vmatpush3.msra.mxu0 %v278_v33  ;;  %551 = vmatpush3.msra.mxu1 %v310_v34 }
  0x35   :  { %514 = vmatprep.subr.mxu0 %v293_v35  ;;  %552 = vmatprep.subr.mxu1 %v325_v36 }
  0x36   :  { %515 = vmatpush3.msra.mxu0 %v277_v37  ;;  %553 = vmatpush3.msra.mxu1 %v309_v38 }
  0x37   :  { %516 = vmatprep.subr.mxu0 %v292_v39  ;;  %554 = vmatprep.subr.mxu1 %v324_v40  ;;  %v497_v40 = vld [vmem:[%s1016_s4] ss:$0 sm:$0xff] }
  0x38   :  { %517 = vmatpush3.msra.mxu0 %v276_v41  ;;  %555 = vmatpush3.msra.mxu1 %v308_v42 }
  0x39   :  { %518 = vmatprep.subr.mxu0 %v291_v43  ;;  %556 = vmatprep.subr.mxu1 %v323_v44 }
  0x3a   :  { %519 = vmatpush3.msra.mxu0 %v275_v45  ;;  %557 = vmatpush3.msra.mxu1 %v307_v46 }
  0x3b   :  { %520 = vmatprep.subr.mxu0 %v290_v47  ;;  %558 = vmatprep.subr.mxu1 %v322_v48 }
  0x3c   :  { %521 = vmatpush3.msra.mxu0 %v274_v49  ;;  %559 = vmatpush3.msra.mxu1 %v306_v50 }
  0x3d   :  { %522 = vmatprep.subr.mxu0 %v289_v51  ;;  %560 = vmatprep.subr.mxu1 %v321_v52 }
  0x3e   :  { %523 = vmatpush3.msra.mxu0 %v273_v53  ;;  %561 = vmatpush3.msra.mxu1 %v305_v54 }
  0x3f   :  { %524 = vmatprep.subr.mxu0 %v288_v55  ;;  %562 = vmatprep.subr.mxu1 %v320_v56 }
  0x40   :  { %525 = vmatpush3.msra.mxu0 %v272_v57  ;;  %563 = vmatpush3.msra.mxu1 %v304_v58 }
  0x41   :  { %526 = vmatprep.subr.mxu0 %v287_v59  ;;  %564 = vmatprep.subr.mxu1 %v319_v60 }
  0x42   :  { %527 = vmatpush3.msra.mxu0 %v271_v61  ;;  %565 = vmatpush3.msra.mxu1 %v303_v62 }
  0x43   :  { %528 = vmatprep.subr.mxu0 %v286_v63  ;;  %566 = vmatprep.subr.mxu1 %v318_v0 }
  0x44   :  { %529 = vmatpush3.msra.mxu0 %v270_v1  ;;  %567 = vmatpush3.msra.mxu1 %v302_v2 }
  0xe2   :  { %v174_v14 = vpop.f32.mrf.mxu0  ;;  %v251_v15 = vpop.f32.mrf.mxu1 }
  0xe3   :  { %v252_v16 = vadd.f32 %v251_v15, %v99_v10  ;;  %v175_v17 = vadd.f32 %v174_v14, %v91_v11 }
  0xe4   :  { %v176_v18 = vpop.f32.mrf.mxu0  ;;  %v253_v19 = vpop.f32.mrf.mxu1 }
  0xe5   :  { %v177_v20 = vadd.f32 %v176_v18, %v95_v12  ;;  %v254_v21 = vadd.f32 %v253_v19, %v103_v13  ;;  %v264_v22 = vmax.f32 %v252_v16, 0.0  ;;  %v262_v28 = vmax.f32 %v175_v17, 0.0 }
  0xe6   :  { %v180_v23 = vpop.f32.mrf.mxu0  ;;  %v257_v24 = vpop.f32.mrf.mxu1 }
  0xe7   :  { %v263_v25 = vmax.f32 %v177_v20, 0.0  ;;  %v265_v26 = vmax.f32 %v254_v21, 0.0  ;;  %v258_v27 = vadd.f32 %v257_v24, %v99_v10  ;;  %v181_v29 = vadd.f32 %v180_v23, %v91_v11 }
  0xe8   :  { %v182_v30 = vpop.f32.mrf.mxu0  ;;  %v259_v31 = vpop.f32.mrf.mxu1 }
  0xe9   :  { %v183_v32 = vadd.f32 %v182_v30, %v95_v12  ;;  %v260_v33 = vadd.f32 %v259_v31, %v103_v13  ;;  %405 = vmatprep.mubr.f32.mxu0 %v263_v25  ;;  %480 = vmatprep.mubr.f32.mxu1 %v265_v26  ;;  %v268_v34 = vmax.f32 %v258_v27, 0.0  ;;  %v266_v37 = vmax.f32 %v181_v29, 0.0 }
  0xea   :  { %406 = vmatmul.mubr.f32.vlgmr.msra.gmra.mxu0 %v262_v28  ;;  %481 = vmatmul.mubr.f32.vlgmr.msra.gmra.mxu1 %v264_v22 }
  0xeb   :  { %v267_v35 = vmax.f32 %v183_v32, 0.0  ;;  %v269_v36 = vmax.f32 %v260_v33, 0.0 }
  0xed   :  { %410 = vmatprep.mubr.f32.mxu0 %v267_v35  ;;  %485 = vmatprep.mubr.f32.mxu1 %v269_v36 }
  0xee   :  { %411 = vmatmul.mubr.f32.gmra.mxu0 %v266_v37  ;;  %486 = vmatmul.mubr.f32.gmra.mxu1 %v268_v34 }
 0x1aa   :  { %v530_v38 = vpop.f32.mrf.mxu0  ;;  %v568_v39 = vpop.f32.mrf.mxu1 }
 0x1ac   :  { %v531_v41 = vpop.f32.mrf.mxu0  ;;  %v569_v42 = vpop.f32.mrf.mxu1 }
 0x1ad   :  { %v532_v43 = vadd.f32 %v531_v41, %v530_v38  ;;  %v570_v47 = vadd.f32 %v569_v42, %v568_v39 }
 0x1ae   :  { %v533_v44 = vpop.f32.mrf.mxu0  ;;  %v571_v45 = vpop.f32.mrf.mxu1 }
 0x1af   :  { %v408_v46 = vadd.f32 %v532_v43, %v497_v40 }
 0x1b0   :  { %v534_v48 = vpop.f32.mrf.mxu0  ;;  %v572_v49 = vpop.f32.mrf.mxu1 }
 0x1b1   :  { %v483_v50 = vadd.f32 %v570_v47, %v408_v46  ;;  %v535_v51 = vadd.f32 %v534_v48, %v533_v44  ;;  %v573_v53 = vadd.f32 %v572_v49, %v571_v45 }
 0x1b3   :  { %491 = vst [vmem:[%s1017_s5] sm:$0xff] %v483_v50  ;;  %v413_v52 = vadd.f32 %v535_v51, %v497_v40 }
 0x1b5   :  { %v488_v54 = vadd.f32 %v573_v53, %v413_v52 }
 0x1b7   :  { %492 = vst [vmem:[%s1017_s5 + $0x8] sm:$0xff] %v488_v54 }

</bundles_post_ra>
